<compile_context>
chip_gen: v5e
topology: v5e:2x2
jax: 0.10.0
libtpu: 0.0.40
codegen_flags: <defaults>
</compile_context>

<pallas_src>
import functools

import jax
import jax.numpy as jnp
import numpy as np
from jax import lax
from jax.experimental import pallas as pl
from jax.experimental.pallas import tpu as pltpu

_LANES = 128
_SUBLANES = 8
_MAX_TILE_ROWS = 1024  # (1024, 128) f32 = 512 KiB per input tile


def _round_up(x, m):
    return ((x + m - 1) // m) * m


def _sublane_align(dtype):
    # Second-minor packing requirement: f32 -> 8, bf16/f16 -> 16, 8-bit -> 32.
    return max(_SUBLANES, 32 // jnp.dtype(dtype).itemsize)


def _extend_mse_kernel(pred_ref, mask_ref, s1_ref, s2_ref, s3_ref, *,
                       tiles_per_split, tile_rows, valid_rows):
    i = pl.program_id(0)  # split (parallel axis; one per TensorCore on v7x)
    k = pl.program_id(1)  # row-tile within the split (reduction axis)

    @pl.when(k == 0)
    def _():
        s1_ref[...] = jnp.zeros_like(s1_ref)
        s2_ref[...] = jnp.zeros_like(s2_ref)
        s3_ref[...] = jnp.zeros_like(s3_ref)

    # Intended (unclamped) tile index. Any row at or beyond `valid_rows`
    # (ragged tail, OOB padding of a partial block, or a clamped duplicate
    # tile of an over-covering grid) is masked to zero -> exact sums.
    t = i * tiles_per_split + k
    row0 = t * tile_rows
    row_ids = row0 + lax.broadcasted_iota(jnp.int32, (tile_rows, _LANES), 0)
    valid = row_ids < valid_rows

    p = jnp.where(valid, pred_ref[...].astype(jnp.float32), 0.0)
    m = jnp.where(valid, mask_ref[...].astype(jnp.float32), 0.0)
    d2 = (p - m) * (p - m)

    # Layout no-op reshape; sum over the leading dim is pure VPU vreg adds.
    g = tile_rows // _SUBLANES
    s1_ref[...] += jnp.sum(m.reshape(g, _SUBLANES, _LANES), axis=0)
    s2_ref[...] += jnp.sum((d2 * m).reshape(g, _SUBLANES, _LANES), axis=0)
    s3_ref[...] += jnp.sum(d2.reshape(g, _SUBLANES, _LANES), axis=0)


def extend_mse_loss(pred, mask, beta, lamda, eps=1e-07):
    """Pallas TPU implementation of extend_mse_loss.forward.

    `eps` is unused, matching the PyTorch reference.
    """
    batch, depth, height, width = pred.shape
    pix_num = depth * height * width
    total = batch * pix_num

    def _prep(x):
        if not jnp.issubdtype(x.dtype, jnp.floating):
            x = x.astype(jnp.float32)  # bool / int masks -> f32
        elif x.dtype == jnp.float64:
            x = x.astype(jnp.float32)
        return x

    pred = _prep(pred)
    mask = _prep(mask)

    align = max(_sublane_align(pred.dtype), _sublane_align(mask.dtype))
    rows_raw = pl.cdiv(total, _LANES)

    if total % _LANES == 0 and rows_raw >= align:
        # Free reshape of the contiguous NCHW buffer -- no extra HBM traffic.
        rows = rows_raw
        pred2d = pred.reshape(rows, _LANES)
        mask2d = mask.reshape(rows, _LANES)
    else:
        # Rare ragged / tiny case: pad a short zero tail (zeros are exact for
        # all three sums).
        rows = _round_up(max(rows_raw, align), align)
        pad = rows * _LANES - total
        pred2d = jnp.pad(pred.reshape(-1), (0, pad)).reshape(rows, _LANES)
        mask2d = jnp.pad(mask.reshape(-1), (0, pad)).reshape(rows, _LANES)

    tile_rows = min(_MAX_TILE_ROWS, rows)
    tile_rows = max(align, (tile_rows // align) * align)
    num_tiles = pl.cdiv(rows, tile_rows)

    # Split the reduction across 2 TensorCores on v7x; serial (and free)
    # on single-TC generations. Duplicate / OOB tiles are clamped in the
    # index_map and fully masked in-kernel.
    nsplit = 2 if num_tiles >= 2 else 1
    tiles_per_split = pl.cdiv(num_tiles, nsplit)
    last_tile = num_tiles - 1

    def in_map(i, k):
        return (jnp.minimum(i * tiles_per_split + k, last_tile), 0)

    kernel = functools.partial(
        _extend_mse_kernel,
        tiles_per_split=tiles_per_split,
        tile_rows=tile_rows,
        valid_rows=rows,
    )

    acc_shape = jax.ShapeDtypeStruct((nsplit * _SUBLANES, _LANES), jnp.float32)
    acc_spec = pl.BlockSpec((_SUBLANES, _LANES), lambda i, k: (i, 0))

    bytes_accessed = int(pred2d.size * pred2d.dtype.itemsize
                         + mask2d.size * mask2d.dtype.itemsize
                         + 3 * nsplit * _SUBLANES * _LANES * 4)

    s1, s2, s3 = pl.pallas_call(
        kernel,
        out_shape=(acc_shape, acc_shape, acc_shape),
        grid_spec=pltpu.PrefetchScalarGridSpec(
            num_scalar_prefetch=0,
            grid=(nsplit, tiles_per_split),
            in_specs=[
                pl.BlockSpec((tile_rows, _LANES), in_map),
                pl.BlockSpec((tile_rows, _LANES), in_map),
            ],
            out_specs=(acc_spec, acc_spec, acc_spec),
        ),
        compiler_params=pltpu.CompilerParams(
            dimension_semantics=("parallel", "arbitrary"),
        ),
        cost_estimate=pl.CostEstimate(
            flops=int(6 * total),
            transcendentals=0,
            bytes_accessed=bytes_accessed,
        ),
    )(pred2d, mask2d)

    # Tiny epilogue: reduce the (nsplit*8, 128) partials and finish the loss.
    s1 = jnp.sum(s1)
    s2 = jnp.sum(s2)
    s3 = jnp.sum(s3)
    y_i = s1 / pix_num
    return 0.5 * (beta * s2 + lamda * y_i * s3) / pix_num


def _reference_extend_mse_loss(pred, mask, beta, lamda):
    pred = pred.astype(jnp.float32)
    mask = mask.astype(jnp.float32)
    _, depth, height, width = pred.shape
    pix_num = depth * height * width
    y_i = jnp.sum(mask) / pix_num
    first_term = beta * mask + lamda * y_i
    return 0.5 * jnp.sum((pred - mask) ** 2 * first_term) / pix_num


def _check(pred, mask, beta, lamda, rtol):
    loss = jax.block_until_ready(extend_mse_loss(pred, mask, beta, lamda))
    ref = jax.block_until_ready(_reference_extend_mse_loss(pred, mask, beta, lamda))
    np.testing.assert_allclose(np.asarray(loss), np.asarray(ref),
                               rtol=rtol, atol=1e-6)


if __name__ == "__main__":
    # Deterministic hyperparameters (module __init__ args).
    beta, lamda = 1.0, 0.5
    key = jax.random.PRNGKey(0)

    # 1) Primary small NCHW case (f32, single tile, no ragged tail).
    k1, k2, key = jax.random.split(key, 3)
    pred = jax.random.uniform(k1, (2, 4, 16, 16), dtype=jnp.float32)
    mask = (jax.random.uniform(k2, (2, 4, 16, 16)) > 0.7).astype(jnp.float32)
    _check(pred, mask, beta, lamda, rtol=1e-5)

    # 2) bf16 inputs: multiple tiles, 2-way split, partial + clamped tiles.
    k1, k2, key = jax.random.split(key, 3)
    pred = jax.random.uniform(k1, (4, 4, 105, 160),
                              dtype=jnp.float32).astype(jnp.bfloat16)
    mask = (jax.random.uniform(k2, (4, 4, 105, 160)) > 0.7).astype(jnp.bfloat16)
    _check(pred, mask, beta, lamda, rtol=1e-4)

    # 3) Ragged total (not a multiple of 128) -> minimal-pad fallback path.
    k1, k2, key = jax.random.split(key, 3)
    pred = jax.random.uniform(k1, (2, 3, 10, 10), dtype=jnp.float32)
    mask = (jax.random.uniform(k2, (2, 3, 10, 10)) > 0.7).astype(jnp.float32)
    _check(pred, mask, beta, lamda, rtol=1e-5)

    print("KERNEL_OK")
</pallas_src>

<mosaic_0001>
module attributes {stable_mosaic.version = 11 : i64} {
  func.func @_extend_mse_kernel(%arg0: i32, %arg1: i32, %arg2: memref<16x128xf32, #tpu.memory_space<vmem>>, %arg3: memref<16x128xf32, #tpu.memory_space<vmem>>, %arg4: memref<8x128xf32, #tpu.memory_space<vmem>>, %arg5: memref<8x128xf32, #tpu.memory_space<vmem>>, %arg6: memref<8x128xf32, #tpu.memory_space<vmem>>) attributes {dimension_semantics = [#tpu.dimension_semantics<parallel>, #tpu.dimension_semantics<arbitrary>], iteration_bounds = array<i64: 1, 1>, scalar_prefetch = 0 : i64, scratch_operands = 0 : i64, tpu.core_type = #tpu.core_type<tc>, window_params = [{transform_indices = @transform_0, window_bounds = array<i64: 16, 128>}, {transform_indices = @transform_1, window_bounds = array<i64: 16, 128>}, {transform_indices = @transform_2, window_bounds = array<i64: 8, 128>}, {transform_indices = @transform_3, window_bounds = array<i64: 8, 128>}, {transform_indices = @transform_4, window_bounds = array<i64: 8, 128>}]} {
    %c0_i32 = arith.constant 0 : i32
    %0 = arith.cmpi eq, %arg1, %c0_i32 : i32
    %1 = arith.extui %0 : i1 to i32
    %c0_i32_0 = arith.constant 0 : i32
    %2 = arith.cmpi ne, %1, %c0_i32_0 : i32
    scf.if %2 {
      %cst_21 = arith.constant 0.000000e+00 : f32
      %36 = vector.broadcast %cst_21 : f32 to vector<8x128xf32>
      %c0_22 = arith.constant 0 : index
      %c0_23 = arith.constant 0 : index
      %37 = vector.load %arg4[%c0_22, %c0_23] : memref<8x128xf32, #tpu.memory_space<vmem>>, vector<8x128xf32>
      tpu.vector_store %arg4[%c0_22, %c0_23], %36 {strides = array<i32>} : memref<8x128xf32, #tpu.memory_space<vmem>>, vector<8x128xf32>,
      %cst_24 = arith.constant 0.000000e+00 : f32
      %38 = vector.broadcast %cst_24 : f32 to vector<8x128xf32>
      %c0_25 = arith.constant 0 : index
      %c0_26 = arith.constant 0 : index
      %39 = vector.load %arg5[%c0_25, %c0_26] : memref<8x128xf32, #tpu.memory_space<vmem>>, vector<8x128xf32>
      tpu.vector_store %arg5[%c0_25, %c0_26], %38 {strides = array<i32>} : memref<8x128xf32, #tpu.memory_space<vmem>>, vector<8x128xf32>,
      %cst_27 = arith.constant 0.000000e+00 : f32
      %40 = vector.broadcast %cst_27 : f32 to vector<8x128xf32>
      %c0_28 = arith.constant 0 : index
      %c0_29 = arith.constant 0 : index
      %41 = vector.load %arg6[%c0_28, %c0_29] : memref<8x128xf32, #tpu.memory_space<vmem>>, vector<8x128xf32>
      tpu.vector_store %arg6[%c0_28, %c0_29], %40 {strides = array<i32>} : memref<8x128xf32, #tpu.memory_space<vmem>>, vector<8x128xf32>,
    } else {
    }
    %c1_i32 = arith.constant 1 : i32
    %3 = arith.muli %arg0, %c1_i32 : i32
    %4 = arith.addi %3, %arg1 : i32
    %c16_i32 = arith.constant 16 : i32
    %5 = arith.muli %4, %c16_i32 : i32
    %6 = tpu.iota {dimensions = array<i32: 0>} : vector<16x128xi32>
    %7 = vector.broadcast %5 : i32 to vector<16x128xi32>
    %8 = arith.addi %7, %6 : vector<16x128xi32>
    %c16_i32_1 = arith.constant 16 : i32
    %9 = vector.broadcast %c16_i32_1 : i32 to vector<16x128xi32>
    %10 = arith.cmpi slt, %8, %9 : vector<16x128xi32>
    %c0 = arith.constant 0 : index
    %c0_2 = arith.constant 0 : index
    %11 = vector.load %arg2[%c0, %c0_2] : memref<16x128xf32, #tpu.memory_space<vmem>>, vector<16x128xf32>
    %cst = arith.constant 0.000000e+00 : f32
    %12 = vector.broadcast %cst : f32 to vector<16x128xf32>
    %13 = arith.select %10, %11, %12 : vector<16x128xi1>, vector<16x128xf32>
    %c0_3 = arith.constant 0 : index
    %c0_4 = arith.constant 0 : index
    %14 = vector.load %arg3[%c0_3, %c0_4] : memref<16x128xf32, #tpu.memory_space<vmem>>, vector<16x128xf32>
    %cst_5 = arith.constant 0.000000e+00 : f32
    %15 = vector.broadcast %cst_5 : f32 to vector<16x128xf32>
    %16 = arith.select %10, %14, %15 : vector<16x128xi1>, vector<16x128xf32>
    %17 = arith.subf %13, %16 : vector<16x128xf32>
    %18 = arith.subf %13, %16 : vector<16x128xf32>
    %19 = arith.mulf %17, %18 : vector<16x128xf32>
    %c0_6 = arith.constant 0 : index
    %c0_7 = arith.constant 0 : index
    %20 = vector.load %arg4[%c0_6, %c0_7] : memref<8x128xf32, #tpu.memory_space<vmem>>, vector<8x128xf32>
    %21 = vector.shape_cast %16 : vector<16x128xf32> to vector<2x8x128xf32>
    %cst_8 = arith.constant dense<0.000000e+00> : vector<8x128xf32>
    %22 = vector.multi_reduction <add>, %21, %cst_8 [0] : vector<2x8x128xf32> to vector<8x128xf32>
    %23 = arith.addf %20, %22 : vector<8x128xf32>
    %c0_9 = arith.constant 0 : index
    %c0_10 = arith.constant 0 : index
    %24 = vector.load %arg4[%c0_9, %c0_10] : memref<8x128xf32, #tpu.memory_space<vmem>>, vector<8x128xf32>
    tpu.vector_store %arg4[%c0_9, %c0_10], %23 {strides = array<i32>} : memref<8x128xf32, #tpu.memory_space<vmem>>, vector<8x128xf32>,
    %c0_11 = arith.constant 0 : index
    %c0_12 = arith.constant 0 : index
    %25 = vector.load %arg5[%c0_11, %c0_12] : memref<8x128xf32, #tpu.memory_space<vmem>>, vector<8x128xf32>
    %26 = arith.mulf %19, %16 : vector<16x128xf32>
    %27 = vector.shape_cast %26 : vector<16x128xf32> to vector<2x8x128xf32>
    %cst_13 = arith.constant dense<0.000000e+00> : vector<8x128xf32>
    %28 = vector.multi_reduction <add>, %27, %cst_13 [0] : vector<2x8x128xf32> to vector<8x128xf32>
    %29 = arith.addf %25, %28 : vector<8x128xf32>
    %c0_14 = arith.constant 0 : index
    %c0_15 = arith.constant 0 : index
    %30 = vector.load %arg5[%c0_14, %c0_15] : memref<8x128xf32, #tpu.memory_space<vmem>>, vector<8x128xf32>
    tpu.vector_store %arg5[%c0_14, %c0_15], %29 {strides = array<i32>} : memref<8x128xf32, #tpu.memory_space<vmem>>, vector<8x128xf32>,
    %c0_16 = arith.constant 0 : index
    %c0_17 = arith.constant 0 : index
    %31 = vector.load %arg6[%c0_16, %c0_17] : memref<8x128xf32, #tpu.memory_space<vmem>>, vector<8x128xf32>
    %32 = vector.shape_cast %19 : vector<16x128xf32> to vector<2x8x128xf32>
    %cst_18 = arith.constant dense<0.000000e+00> : vector<8x128xf32>
    %33 = vector.multi_reduction <add>, %32, %cst_18 [0] : vector<2x8x128xf32> to vector<8x128xf32>
    %34 = arith.addf %31, %33 : vector<8x128xf32>
    %c0_19 = arith.constant 0 : index
    %c0_20 = arith.constant 0 : index
    %35 = vector.load %arg6[%c0_19, %c0_20] : memref<8x128xf32, #tpu.memory_space<vmem>>, vector<8x128xf32>
    tpu.vector_store %arg6[%c0_19, %c0_20], %34 {strides = array<i32>} : memref<8x128xf32, #tpu.memory_space<vmem>>, vector<8x128xf32>,
    return
  }
  func.func @transform_0(%arg0: i32, %arg1: i32) -> (i32, i32) {
    %c1_i32 = arith.constant 1 : i32
    %0 = arith.muli %arg0, %c1_i32 : i32
    %1 = arith.addi %0, %arg1 : i32
    %c0_i32 = arith.constant 0 : i32
    %2 = arith.minsi %1, %c0_i32 : i32
    %c0_i32_0 = arith.constant 0 : i32
    %c0_i32_1 = arith.constant 0 : i32
    return %2, %c0_i32_0 : i32, i32
  }
  func.func @transform_1(%arg0: i32, %arg1: i32) -> (i32, i32) {
    %c1_i32 = arith.constant 1 : i32
    %0 = arith.muli %arg0, %c1_i32 : i32
    %1 = arith.addi %0, %arg1 : i32
    %c0_i32 = arith.constant 0 : i32
    %2 = arith.minsi %1, %c0_i32 : i32
    %c0_i32_0 = arith.constant 0 : i32
    %c0_i32_1 = arith.constant 0 : i32
    return %2, %c0_i32_0 : i32, i32
  }
  func.func @transform_2(%arg0: i32, %arg1: i32) -> (i32, i32) {
    %c0_i32 = arith.constant 0 : i32
    %c0_i32_0 = arith.constant 0 : i32
    return %arg0, %c0_i32 : i32, i32
  }
  func.func @transform_3(%arg0: i32, %arg1: i32) -> (i32, i32) {
    %c0_i32 = arith.constant 0 : i32
    %c0_i32_0 = arith.constant 0 : i32
    return %arg0, %c0_i32 : i32, i32
  }
  func.func @transform_4(%arg0: i32, %arg1: i32) -> (i32, i32) {
    %c0_i32 = arith.constant 0 : i32
    %c0_i32_0 = arith.constant 0 : i32
    return %arg0, %c0_i32 : i32, i32
  }
}

</mosaic_0001>

<bundles_post_ra>
// kernel: tpu_custom_call.1
= control target key start
LH: loop header
LB: loop body
LE: loop exit
PB: predicated region body
PF: predicated region fallthrough
CT: control target
= control target key end

     0   :  { %10 = vsyncpa [#allocation3], 0  ;;  %s347_s0 = inlined_call_operand.hbm [shape: f32[16,128], index: 0, kind: input, shape index: {}]   ;;  %s348_s1 = inlined_call_operand.hbm [shape: f32[16,128], index: 1, kind: input, shape index: {}]   ;;  %s349_s2 = inlined_call_operand.hbm [shape: f32[8,128], index: 2, kind: output, shape index: {0}]   ;;  %s350_s3 = inlined_call_operand.hbm [shape: f32[8,128], index: 3, kind: output, shape index: {1}]   ;;  %s351_s4 = inlined_call_operand.hbm [shape: f32[8,128], index: 4, kind: output, shape index: {2}]  }
   0x1   :  { %11 = vsyncpa [#allocation6], 0 }
   0x2   :  { %12 = vsyncpa [#allocation4], 0 }
   0x3   :  { %13 = vsyncpa [#allocation9], 0  ;;  %s24_s17 = sshll.u32 %s347_s0, 4  ;;  %s300_s18 = smov [#allocation2]   ;;  %s25_s17 = int_to_ptr.hbm [resolvable:$true] %s24_s17 }
   0x4   :  { %s26_s19 = sshll.u32 %s300_s18, 4  ;;  %s43_s22 = sshll.u32 %s348_s1, 4  ;;  %s27_s19 = int_to_ptr.vmem [resolvable:$true] %s26_s19  ;;  %s44_s22 = int_to_ptr.hbm [resolvable:$true] %s43_s22 }
   0x5   :  { %s301_s23 = smov 128   ;;  %s302_s24 = smov 8  }
   0x6   :  { %32 = dma.hbm_to_vmem [thread:$0]  %s25_s17, 256, %s27_s19, [#allocation3], %s301_s23, %s301_s23, %s302_s24  }
   0x7   :  { %s303_s25 = smov [#allocation5]  }
   0x8   :  { %s45_s26 = sshll.u32 %s303_s25, 4  ;;  %s46_s26 = int_to_ptr.vmem [resolvable:$true] %s45_s26 }
   0x9   :  { %51 = dma.hbm_to_vmem [thread:$0]  %s44_s22, 256, %s46_s26, [#allocation6], %s301_s23, %s301_s23, %s302_s24  }
   0xa   :  { %292 = dma.done.wait [#allocation3], 256  }
   0xb   :  { %293 = vsyncadd [#allocation3], 4294967040 }
   0xc   :  { %294 = dma.done.wait [#allocation6], 256  }
   0xd   :  { %295 = vsyncadd [#allocation6], 4294967040  ;;  %v85_v0 = vld [vmem:[#allocation2] sm:$0xff]  ;;  %v86_v1 = vld [vmem:[#allocation2 + $0x8] sm:$0xff]  ;;  %s304_s0 = smov [#allocation7]   ;;  %s118_s29 = sshll.u32 %s349_s2, 4  ;;  %s119_s29 = int_to_ptr.hbm [resolvable:$true] %s118_s29 }
   0xe   :  { %v89_v2 = vld [vmem:[#allocation5] sm:$0xff]  ;;  %v90_v3 = vld [vmem:[#allocation5 + $0x8] sm:$0xff]  ;;  %s116_s27 = sshll.u32 %s304_s0, 4  ;;  %s305_s30 = smov [#allocation8]   ;;  %s117_s27 = int_to_ptr.vmem [resolvable:$true] %s116_s27 }
   0xf   :  { %v93_v4 = vsub.f32 %v85_v0, %v89_v2  ;;  %v94_v5 = vsub.f32 %v86_v1, %v90_v3  ;;  %v98_v6 = vadd.f32 %v90_v3, %v89_v2  ;;  %s127_s5 = sshll.u32 %s305_s30, 4  ;;  %s129_s8 = sshll.u32 %s350_s3, 4  ;;  %s128_s5 = int_to_ptr.vmem [resolvable:$true] %s127_s5  ;;  %s130_s8 = int_to_ptr.hbm [resolvable:$true] %s129_s8 }
  0x10   :  { %s306_s9 = smov [#allocation10]   ;;  %s140_s12 = sshll.u32 %s351_s4, 4  ;;  %s141_s12 = int_to_ptr.hbm [resolvable:$true] %s140_s12 }
  0x11   :  { %v95_v7 = vmul.f32 %v93_v4, %v93_v4  ;;  %v96_v8 = vmul.f32 %v94_v5, %v94_v5  ;;  %100 = vst [vmem:[#allocation7] sm:$0xff] %v98_v6  ;;  %s138_s2 = sshll.u32 %s306_s9, 4  ;;  %s139_s2 = int_to_ptr.vmem [resolvable:$true] %s138_s2 }
  0x12   :  { %121 = dma.vmem_to_hbm [thread:$0]  %s117_s27, 128, %s119_s29, [#allocation4]  }
  0x13   :  { %v102_v9 = vmul.f32 %v95_v7, %v89_v2  ;;  %v103_v10 = vmul.f32 %v96_v8, %v90_v3  ;;  %v108_v11 = vadd.f32 %v96_v8, %v95_v7 }
  0x15   :  { %v104_v12 = vadd.f32 %v103_v10, %v102_v9  ;;  %110 = vst [vmem:[#allocation10] sm:$0xff] %v108_v11 }
  0x17   :  { %106 = vst [vmem:[#allocation8] sm:$0xff] %v104_v12 }
  0x18   :  { %132 = dma.vmem_to_hbm [thread:$0]  %s128_s5, 128, %s130_s8, [#allocation9]  }
  0x19   :  { %143 = dma.vmem_to_hbm [thread:$0]  %s139_s2, 128, %s141_s12, [#allocation9]  }
  0x1a   :  { %296 = dma.done.wait [#allocation4], 128  }
  0x1b   :  { %297 = vsyncadd [#allocation4], 4294967168 }
  0x1c   :  { %298 = dma.done.wait [#allocation9], 256  }
  0x1d   :  { %299 = vsyncadd [#allocation9], 4294967040 }
  0x1e   :  { %156 = vsyncpa [#allocation3], 1 }
  0x1f   :  { %157 = vsyncpa [#allocation6], 1 }
  0x20   :  { %158 = vsyncpa [#allocation4], 1 }
  0x21   :  { %159 = vsyncpa [#allocation9], 1 }

</bundles_post_ra>
